<compile_context>
chip_gen: v6e
topology: v6e:2x2x1
jax: 0.10.0
libtpu: 0.0.40
codegen_flags: <defaults>
</compile_context>

<pallas_src>
import jax
import jax.numpy as jnp
from jax.experimental import pallas as pl
from jax.experimental.pallas import tpu as pltpu


# ----------------------------------------------------------------------------
# Default forward: pure identity (the fastest path on every TPU generation).
# ----------------------------------------------------------------------------
def transfered_base_forward(x):
    return x


# ----------------------------------------------------------------------------
# Optional materialized-copy path: Pallas HBM->HBM DMA copy, no VMEM staging.
# ----------------------------------------------------------------------------
_MIN_CHUNK_BYTES = 512 * 1024   # below ~0.5 MiB a single DMA already saturates
_MAX_CHUNKS = 4                 # a few in-flight DMAs overlap read/write streams


def _chunk_rows(rows, total_bytes):
    """Static (start, size) chunks along the leading axis (computed at trace time)."""
    if rows <= 1 or total_bytes < 2 * _MIN_CHUNK_BYTES:
        return ((0, rows),)
    n_chunks = int(min(_MAX_CHUNKS, rows, max(1, total_bytes // _MIN_CHUNK_BYTES)))
    base, rem = divmod(rows, n_chunks)
    chunks, start = [], 0
    for i in range(n_chunks):
        size = base + (1 if i < rem else 0)
        if size > 0:
            chunks.append((start, size))
        start += size
    return tuple(chunks)


def _make_dma_copy_kernel(chunks, rows):
    """Kernel copying x -> o entirely with HBM->HBM DMAs (no VMEM round-trip)."""

    def kernel(x_ref, o_ref, sem):
        if len(chunks) == 1 and chunks[0] == (0, rows):
            # Whole-array copy in a single DMA.
            cp = pltpu.make_async_copy(x_ref, o_ref, sem.at[0])
            cp.start()
            cp.wait()
        else:
            copies = []
            for idx, (start, size) in enumerate(chunks):
                cp = pltpu.make_async_copy(
                    x_ref.at[pl.ds(start, size)],
                    o_ref.at[pl.ds(start, size)],
                    sem.at[idx],
                )
                cp.start()          # start all DMAs first -> they run concurrently
                copies.append(cp)
            for cp in copies:
                cp.wait()

    return kernel


def _copy_impl(x):
    n = x.size
    if n == 0:
        return x

    xv = x if x.ndim > 0 else x.reshape(1)
    rows = xv.shape[0]
    total_bytes = n * x.dtype.itemsize
    chunks = _chunk_rows(rows, total_bytes)

    out = pl.pallas_call(
        _make_dma_copy_kernel(chunks, rows),
        out_shape=jax.ShapeDtypeStruct(xv.shape, xv.dtype),
        in_specs=[pl.BlockSpec(memory_space=pl.ANY)],
        out_specs=pl.BlockSpec(memory_space=pl.ANY),
        scratch_shapes=[pltpu.SemaphoreType.DMA((len(chunks),))],
        cost_estimate=pl.CostEstimate(
            flops=0, transcendentals=0, bytes_accessed=2 * total_bytes),
    )(xv)

    return out.reshape(x.shape)


# Jit once; shapes are static at trace time so all chunking logic runs in Python.
transfered_base_forward_materialized = jax.jit(_copy_impl)


if __name__ == "__main__":
    key = jax.random.PRNGKey(0)

    # NCHW input matching how the PyTorch module is called:
    # batch=2, channels=4, spatial=16x16.
    x = jax.random.normal(key, (2, 4, 16, 16), dtype=jnp.float32)

    # 1) Default forward: identity pass-through (no kernel, no HBM traffic).
    y = transfered_base_forward(x)
    y = jax.block_until_ready(y)
    assert y.shape == x.shape and y.dtype == x.dtype
    assert bool(jnp.all(y == x)), "identity forward mismatch"

    # 2) Materialized-copy path (Pallas HBM->HBM DMA kernel), small input.
    z = transfered_base_forward_materialized(x)
    z = jax.block_until_ready(z)
    assert z.shape == x.shape and z.dtype == x.dtype
    assert bool(jnp.all(z == x)), "DMA-copy forward mismatch (small)"

    # 3) Same kernel on a moderately larger input to exercise the multi-chunk,
    #    overlapped-DMA path (8*64*32*32*4 B = 2 MiB -> 4 chunks).
    key2 = jax.random.PRNGKey(0)
    x2 = jax.random.normal(key2, (8, 64, 32, 32), dtype=jnp.float32)
    z2 = transfered_base_forward_materialized(x2)
    z2 = jax.block_until_ready(z2)
    assert z2.shape == x2.shape and z2.dtype == x2.dtype
    assert bool(jnp.all(z2 == x2)), "DMA-copy forward mismatch (chunked)"

    print("KERNEL_OK")
</pallas_src>

<mosaic_0001>
module attributes {stable_mosaic.version = 11 : i64} {
  func.func @kernel(%arg0: memref<2x4x16x16xf32, #tpu.memory_space<any>>, %arg1: memref<2x4x16x16xf32, #tpu.memory_space<any>>, %arg2: memref<1x!tpu.dma_semaphore, #tpu.memory_space<semaphore_mem>>) attributes {dimension_semantics = [], scalar_prefetch = 0 : i64, scratch_operands = 1 : i64, tpu.core_type = #tpu.core_type<tc>} {
    %c0_i32 = arith.constant 0 : i32
    %0 = tpu.memref_slice %arg2[%c0_i32] : memref<1x!tpu.dma_semaphore, #tpu.memory_space<semaphore_mem>> -> memref<1x!tpu.dma_semaphore, #tpu.memory_space<semaphore_mem>>
    %1 = tpu.memref_squeeze %0 : memref<1x!tpu.dma_semaphore, #tpu.memory_space<semaphore_mem>> -> memref<!tpu.dma_semaphore, #tpu.memory_space<semaphore_mem>>
    tpu.enqueue_dma source(%arg0 : memref<2x4x16x16xf32, #tpu.memory_space<any>>) target(%arg1 : memref<2x4x16x16xf32, #tpu.memory_space<any>>) target_semaphore(%1 : memref<!tpu.dma_semaphore, #tpu.memory_space<semaphore_mem>>)
    %c0_i32_0 = arith.constant 0 : i32
    %2 = tpu.memref_slice %arg2[%c0_i32_0] : memref<1x!tpu.dma_semaphore, #tpu.memory_space<semaphore_mem>> -> memref<1x!tpu.dma_semaphore, #tpu.memory_space<semaphore_mem>>
    %3 = tpu.memref_squeeze %2 : memref<1x!tpu.dma_semaphore, #tpu.memory_space<semaphore_mem>> -> memref<!tpu.dma_semaphore, #tpu.memory_space<semaphore_mem>>
    tpu.wait_dma2 semaphore(%3 : memref<!tpu.dma_semaphore, #tpu.memory_space<semaphore_mem>>) src(%arg0 : memref<2x4x16x16xf32, #tpu.memory_space<any>>) dst(%arg1 : memref<2x4x16x16xf32, #tpu.memory_space<any>>)
    return
  }
}

</mosaic_0001>

<bundles_post_ra>
// kernel: _copy_impl.1
= control target key start
LH: loop header
LB: loop body
LE: loop exit
PB: predicated region body
PF: predicated region fallthrough
CT: control target
= control target key end

     0   :  { %s30_s6 = smov [#allocation2]   ;;  %s31_s7 = smov 131072   ;;  %s49_s0 = inlined_call_operand.hbm [shape: f32[2,4,16,16], index: 0, kind: input, shape index: {}]   ;;  %s50_s1 = inlined_call_operand.hbm [shape: f32[2,4,16,16], index: 1, kind: output, shape index: {}]  }
   0x1   :  { %s32_s8 = smov 0  }
   0x2   :  { %12 = dma.general %s49_s0, 2048, %s50_s1, %s30_s6, %s31_s7, [#allocation4], %s32_s8, 0  }
   0x3   :  { %28 = dma.done.wait [#allocation2], 2048 }
   0x4   :  { %29 = vsyncadd [#allocation2], 4294965248 }
   0x5   :  { %18 = vsyncmov [#allocation2] }
   0x8   :  { %s19_s13 = vpop.sfrf %18 }
   0x9   :  { %p24_p0 = scmp.ne.s32.totalorder %s19_s13, 0 }
   0xb   :  { %23 = shalt.err (%p24_p0)  }

</bundles_post_ra>
